<compile_context>
chip_gen: v6e
topology: v6e:2x2x1
jax: 0.10.0
libtpu: 0.0.40
codegen_flags: <defaults>
</compile_context>

<pallas_src>
import functools

import jax
import jax.numpy as jnp
from jax import lax
from jax.experimental import pallas as pl
from jax.experimental.pallas import tpu as pltpu

LANE = 128


def _round_up(x, m):
    return ((x + m - 1) // m) * m


def _pad_to(a, shape):
    pads = [(0, s - d) for d, s in zip(a.shape, shape)]
    if all(p == (0, 0) for p in pads):
        return a
    return jnp.pad(a, pads)


def _mlp_kernel(n_hidden, matmul_dtype, precision, *refs):
    """refs = (x_ref, w0, b0, ..., w_out, b_out, o_ref).

    Hidden weight dims are lane-padded (multiple of 128) and VMEM-resident across the batch
    grid; x/out tiles are the only per-step DMA traffic.  The output feature dim keeps its
    true width, so there are no padded logit lanes and no softmax masking."""
    x_ref = refs[0]
    o_ref = refs[-1]
    p = refs[1:-1]

    # Cast to the MXU dtype inside the kernel (cheap VPU work) instead of a wrapper HBM pass.
    h = x_ref[...].astype(matmul_dtype)

    # Hidden layers: Linear (MXU, f32 accumulate) + bias + ReLU.  Padded hidden lanes have zero
    # weights/bias, so they stay exactly 0 through Linear+ReLU and contribute nothing downstream.
    for i in range(n_hidden):
        w = p[2 * i][...]
        b = p[2 * i + 1][...]
        acc = jnp.dot(h, w, preferred_element_type=jnp.float32, precision=precision)
        h = jnp.maximum(acc + b, 0.0).astype(matmul_dtype)

    # Output layer: Linear to the *unpadded* class dim, then softmax over dim=1.
    logits = jnp.dot(h, p[-2][...], preferred_element_type=jnp.float32,
                     precision=precision) + p[-1][...]
    m = jnp.max(logits, axis=-1, keepdims=True)
    e = jnp.exp(logits - m)
    denom = jnp.sum(e, axis=-1, keepdims=True)
    # Exact divide (not approx reciprocal) so rows sum to 1 to f32 rounding.
    o_ref[...] = (e / denom).astype(o_ref.dtype)


def sign_lang_nn_forward(x, params, *, matmul_dtype=jnp.bfloat16,
                         out_dtype=jnp.float32, block_batch=2048):
    """params: flat list [w0, b0, ..., w_out, b_out]; weights (in, out) (transposed vs PyTorch),
    biases (1, out) or (out,). Returns softmax probabilities, shape (batch, out_features)."""
    mm_dt = jnp.dtype(matmul_dtype)
    n_layers = len(params) // 2
    n_hidden = n_layers - 1
    batch, in_features = x.shape
    out_features = params[-2].shape[-1]

    # ---- Parameters: pad hidden feature dims to lane-dense multiples of 128 (done once). ----
    # First layer keeps K = in_features (x is passed unpadded); last layer keeps N = out_features
    # (so the kernel never materialises or stores padded logit lanes).
    padded_params = []
    prev = in_features
    for i in range(n_layers):
        w = params[2 * i]
        b = params[2 * i + 1].reshape(1, -1)
        is_last = i == n_layers - 1
        o_dim = w.shape[1] if is_last else _round_up(w.shape[1], LANE)
        padded_params.append(_pad_to(w, (prev, o_dim)).astype(mm_dt))
        padded_params.append(_pad_to(b, (1, o_dim)).astype(jnp.float32))
        prev = o_dim

    # ---- Batch tiling. ----
    sublane = 16 if mm_dt == jnp.dtype(jnp.bfloat16) else 8
    batch_min = _round_up(batch, sublane)
    n_steps = pl.cdiv(batch_min, block_batch)
    if n_steps == 1 and batch_min >= 2 * sublane:
        n_steps = 2  # v7x megacore: give the 'parallel' axis >= 2 steps; ~free on v5e/v6e.
    tb = _round_up(pl.cdiv(batch_min, n_steps), sublane)
    batch_pad = tb * n_steps

    # Only the batch dim is ever padded (and only when needed); no feature pad, no dtype cast.
    x_in = x if batch_pad == batch else jnp.pad(x, ((0, batch_pad - batch), (0, 0)))

    precision = (lax.Precision.HIGHEST if mm_dt == jnp.dtype(jnp.float32)
                 else lax.Precision.DEFAULT)
    kernel = functools.partial(_mlp_kernel, n_hidden, mm_dt, precision)

    # Weights/biases: constant index_map -> VMEM-resident across all grid steps.
    param_specs = [pl.BlockSpec(p.shape, lambda i: (0, 0)) for p in padded_params]

    # Rough VMEM budget: double-buffered x/out tiles + resident params + f32 intermediates.
    # Only raise the scoped limit when needed; 32 MiB is safe on every generation (v5e default
    # is 16 MiB scoped, v6e/v7x default 32 MiB, v7x physical 64 MiB).
    hidden_pad = max(p.shape[-1] for p in padded_params)
    est = (2 * tb * in_features * x.dtype.itemsize
           + 2 * tb * out_features * jnp.dtype(out_dtype).itemsize
           + sum(p.size * p.dtype.itemsize for p in padded_params)
           + 2 * tb * hidden_pad * 4)
    vmem_limit = 32 * 1024 * 1024 if est > 14 * 1024 * 1024 else None
    # TODO(synk): for block_batch > ~4096 (or very wide in_features) re-derive est and raise the
    # limit further only on v5e/v6e (v7x is capped at 64 MiB physical VMEM).

    out = pl.pallas_call(
        kernel,
        out_shape=jax.ShapeDtypeStruct((batch_pad, out_features), out_dtype),
        grid=(n_steps,),
        in_specs=[pl.BlockSpec((tb, in_features), lambda i: (i, 0))] + param_specs,
        out_specs=pl.BlockSpec((tb, out_features), lambda i: (i, 0)),
        compiler_params=pltpu.CompilerParams(
            dimension_semantics=("parallel",),
            vmem_limit_bytes=vmem_limit,
        ),
    )(x_in, *padded_params)

    return out if batch_pad == batch else out[:batch]


def init_params(key, n_flayers, in_features, hidden_size, out_features):
    """Deterministic synthetic init mimicking nn.Linear's uniform(-1/sqrt(fan_in), 1/sqrt(fan_in))."""
    params = []
    fan_in = in_features
    dims = [hidden_size] * n_flayers + [out_features]
    for out_dim in dims:
        key, kw, kb = jax.random.split(key, 3)
        bound = 1.0 / jnp.sqrt(jnp.float32(fan_in))
        w = jax.random.uniform(kw, (fan_in, out_dim), jnp.float32, -bound, bound)
        b = jax.random.uniform(kb, (1, out_dim), jnp.float32, -bound, bound)
        params.extend([w, b])
        fan_in = out_dim
    return params


def reference_forward(x, params, precision=None):
    n_hidden = len(params) // 2 - 1
    h = x
    for i in range(n_hidden):
        h = jnp.maximum(jnp.dot(h, params[2 * i], precision=precision) + params[2 * i + 1], 0.0)
    logits = jnp.dot(h, params[-2], precision=precision) + params[-1]
    return jax.nn.softmax(logits, axis=1)


if __name__ == "__main__":
    # Small shapes consistent with the module: batch=8, in_features=64, hidden=32, out=16, 2 hidden layers.
    n_flayers, in_features, hidden_size, out_features = 2, 64, 32, 16
    batch = 8

    key = jax.random.PRNGKey(0)
    key, kx = jax.random.split(key)
    x = jax.random.normal(kx, (batch, in_features), jnp.float32)
    params = init_params(key, n_flayers, in_features, hidden_size, out_features)

    ref = reference_forward(x, params, precision=jax.lax.Precision.HIGHEST)

    # f32-matmul path (precision=HIGHEST inside the kernel): tight check.
    out_f32 = jax.block_until_ready(
        sign_lang_nn_forward(x, params, matmul_dtype=jnp.float32))
    assert out_f32.shape == (batch, out_features)
    assert jnp.allclose(jnp.sum(out_f32, axis=1), 1.0, atol=1e-3), "f32 rows must sum to 1"
    assert jnp.allclose(out_f32, ref, atol=1e-3, rtol=1e-3), "f32 path mismatch vs reference"

    # Default bf16-matmul path (MXU-native on v6e/v7x); relaxed tolerance for bf16 operands.
    out_bf16 = jax.block_until_ready(sign_lang_nn_forward(x, params))
    assert out_bf16.shape == (batch, out_features)
    assert jnp.allclose(jnp.sum(out_bf16, axis=1), 1.0, atol=1e-3), "bf16 rows must sum to 1"
    assert jnp.allclose(out_bf16, ref, atol=3e-2, rtol=3e-2), "bf16 path mismatch vs reference"

    print("KERNEL_OK")
</pallas_src>

<mosaic_0001>
module attributes {stable_mosaic.version = 11 : i64} {
  func.func @_mlp_kernel(%arg0: i32, %arg1: memref<8x64xf32, #tpu.memory_space<vmem>>, %arg2: memref<64x128xf32, #tpu.memory_space<vmem>>, %arg3: memref<1x128xf32, #tpu.memory_space<vmem>>, %arg4: memref<128x128xf32, #tpu.memory_space<vmem>>, %arg5: memref<1x128xf32, #tpu.memory_space<vmem>>, %arg6: memref<128x16xf32, #tpu.memory_space<vmem>>, %arg7: memref<1x16xf32, #tpu.memory_space<vmem>>, %arg8: memref<8x16xf32, #tpu.memory_space<vmem>>) attributes {dimension_semantics = [#tpu.dimension_semantics<parallel>], iteration_bounds = array<i64: 1>, scalar_prefetch = 0 : i64, scratch_operands = 0 : i64, tpu.core_type = #tpu.core_type<tc>, window_params = [{transform_indices = @transform_0, window_bounds = array<i64: 8, 64>}, {pipeline_mode = #tpu.pipeline_mode<synchronous>, transform_indices = @transform_1, window_bounds = array<i64: 64, 128>}, {pipeline_mode = #tpu.pipeline_mode<synchronous>, transform_indices = @transform_2, window_bounds = array<i64: 1, 128>}, {pipeline_mode = #tpu.pipeline_mode<synchronous>, transform_indices = @transform_3, window_bounds = array<i64: 128, 128>}, {pipeline_mode = #tpu.pipeline_mode<synchronous>, transform_indices = @transform_4, window_bounds = array<i64: 1, 128>}, {pipeline_mode = #tpu.pipeline_mode<synchronous>, transform_indices = @transform_5, window_bounds = array<i64: 128, 16>}, {pipeline_mode = #tpu.pipeline_mode<synchronous>, transform_indices = @transform_6, window_bounds = array<i64: 1, 16>}, {transform_indices = @transform_7, window_bounds = array<i64: 8, 16>}]} {
    %c0 = arith.constant 0 : index
    %c0_0 = arith.constant 0 : index
    %0 = vector.load %arg1[%c0, %c0_0] : memref<8x64xf32, #tpu.memory_space<vmem>>, vector<8x64xf32>
    %c0_1 = arith.constant 0 : index
    %c0_2 = arith.constant 0 : index
    %1 = vector.load %arg2[%c0_1, %c0_2] : memref<64x128xf32, #tpu.memory_space<vmem>>, vector<64x128xf32>
    %c0_3 = arith.constant 0 : index
    %c0_4 = arith.constant 0 : index
    %2 = vector.load %arg3[%c0_3, %c0_4] : memref<1x128xf32, #tpu.memory_space<vmem>>, vector<1x128xf32>
    %cst = arith.constant dense<0.000000e+00> : vector<8x128xf32>
    %3 = tpu.matmul %0, %1, %cst {dimension_numbers = #tpu.dot_dimension_numbers<[1], [0], [0], [1], [0, 0, 1, 1], [], []>, precision = #tpu.contract_precision<fp32>} : vector<8x64xf32>, vector<64x128xf32>, vector<8x128xf32> -> vector<8x128xf32>
    %4 = vector.broadcast %2 : vector<1x128xf32> to vector<8x128xf32>
    %5 = arith.addf %3, %4 : vector<8x128xf32>
    %cst_5 = arith.constant 0.000000e+00 : f32
    %6 = vector.broadcast %cst_5 : f32 to vector<8x128xf32>
    %7 = arith.maximumf %5, %6 : vector<8x128xf32>
    %c0_6 = arith.constant 0 : index
    %c0_7 = arith.constant 0 : index
    %8 = vector.load %arg4[%c0_6, %c0_7] : memref<128x128xf32, #tpu.memory_space<vmem>>, vector<128x128xf32>
    %c0_8 = arith.constant 0 : index
    %c0_9 = arith.constant 0 : index
    %9 = vector.load %arg5[%c0_8, %c0_9] : memref<1x128xf32, #tpu.memory_space<vmem>>, vector<1x128xf32>
    %cst_10 = arith.constant dense<0.000000e+00> : vector<8x128xf32>
    %10 = tpu.matmul %7, %8, %cst_10 {dimension_numbers = #tpu.dot_dimension_numbers<[1], [0], [0], [1], [0, 0, 1, 1], [], []>, precision = #tpu.contract_precision<fp32>} : vector<8x128xf32>, vector<128x128xf32>, vector<8x128xf32> -> vector<8x128xf32>
    %11 = vector.broadcast %9 : vector<1x128xf32> to vector<8x128xf32>
    %12 = arith.addf %10, %11 : vector<8x128xf32>
    %cst_11 = arith.constant 0.000000e+00 : f32
    %13 = vector.broadcast %cst_11 : f32 to vector<8x128xf32>
    %14 = arith.maximumf %12, %13 : vector<8x128xf32>
    %c0_12 = arith.constant 0 : index
    %c0_13 = arith.constant 0 : index
    %15 = vector.load %arg6[%c0_12, %c0_13] : memref<128x16xf32, #tpu.memory_space<vmem>>, vector<128x16xf32>
    %cst_14 = arith.constant dense<0.000000e+00> : vector<8x16xf32>
    %16 = tpu.matmul %14, %15, %cst_14 {dimension_numbers = #tpu.dot_dimension_numbers<[1], [0], [0], [1], [0, 0, 1, 1], [], []>, precision = #tpu.contract_precision<fp32>} : vector<8x128xf32>, vector<128x16xf32>, vector<8x16xf32> -> vector<8x16xf32>
    %c0_15 = arith.constant 0 : index
    %c0_16 = arith.constant 0 : index
    %17 = vector.load %arg7[%c0_15, %c0_16] : memref<1x16xf32, #tpu.memory_space<vmem>>, vector<1x16xf32>
    %18 = vector.broadcast %17 : vector<1x16xf32> to vector<8x16xf32>
    %19 = arith.addf %16, %18 : vector<8x16xf32>
    %cst_17 = arith.constant dense<0xFF800000> : vector<8xf32>
    %20 = vector.multi_reduction <maximumf>, %19, %cst_17 [1] : vector<8x16xf32> to vector<8xf32>
    %21 = vector.shape_cast %20 : vector<8xf32> to vector<8x1xf32>
    %22 = vector.broadcast %21 : vector<8x1xf32> to vector<8x16xf32>
    %23 = arith.subf %19, %22 : vector<8x16xf32>
    %24 = math.exp %23 : vector<8x16xf32>
    %cst_18 = arith.constant dense<0.000000e+00> : vector<8xf32>
    %25 = vector.multi_reduction <add>, %24, %cst_18 [1] : vector<8x16xf32> to vector<8xf32>
    %26 = vector.shape_cast %25 : vector<8xf32> to vector<8x1xf32>
    %27 = vector.broadcast %26 : vector<8x1xf32> to vector<8x16xf32>
    %28 = arith.divf %24, %27 : vector<8x16xf32>
    %c0_19 = arith.constant 0 : index
    %c0_20 = arith.constant 0 : index
    %29 = vector.load %arg8[%c0_19, %c0_20] : memref<8x16xf32, #tpu.memory_space<vmem>>, vector<8x16xf32>
    tpu.vector_store %arg8[%c0_19, %c0_20], %28 {strides = array<i32>} : memref<8x16xf32, #tpu.memory_space<vmem>>, vector<8x16xf32>,
    return
  }
  func.func @transform_0(%arg0: i32) -> (i32, i32) {
    %c0_i32 = arith.constant 0 : i32
    %c0_i32_0 = arith.constant 0 : i32
    return %arg0, %c0_i32 : i32, i32
  }
  func.func @transform_1(%arg0: i32) -> (i32, i32) {
    %c0_i32 = arith.constant 0 : i32
    %c0_i32_0 = arith.constant 0 : i32
    %c0_i32_1 = arith.constant 0 : i32
    return %c0_i32, %c0_i32_0 : i32, i32
  }
  func.func @transform_2(%arg0: i32) -> (i32, i32) {
    %c0_i32 = arith.constant 0 : i32
    %c0_i32_0 = arith.constant 0 : i32
    %c0_i32_1 = arith.constant 0 : i32
    return %c0_i32, %c0_i32_0 : i32, i32
  }
  func.func @transform_3(%arg0: i32) -> (i32, i32) {
    %c0_i32 = arith.constant 0 : i32
    %c0_i32_0 = arith.constant 0 : i32
    %c0_i32_1 = arith.constant 0 : i32
    return %c0_i32, %c0_i32_0 : i32, i32
  }
  func.func @transform_4(%arg0: i32) -> (i32, i32) {
    %c0_i32 = arith.constant 0 : i32
    %c0_i32_0 = arith.constant 0 : i32
    %c0_i32_1 = arith.constant 0 : i32
    return %c0_i32, %c0_i32_0 : i32, i32
  }
  func.func @transform_5(%arg0: i32) -> (i32, i32) {
    %c0_i32 = arith.constant 0 : i32
    %c0_i32_0 = arith.constant 0 : i32
    %c0_i32_1 = arith.constant 0 : i32
    return %c0_i32, %c0_i32_0 : i32, i32
  }
  func.func @transform_6(%arg0: i32) -> (i32, i32) {
    %c0_i32 = arith.constant 0 : i32
    %c0_i32_0 = arith.constant 0 : i32
    %c0_i32_1 = arith.constant 0 : i32
    return %c0_i32, %c0_i32_0 : i32, i32
  }
  func.func @transform_7(%arg0: i32) -> (i32, i32) {
    %c0_i32 = arith.constant 0 : i32
    %c0_i32_0 = arith.constant 0 : i32
    return %arg0, %c0_i32 : i32, i32
  }
}

</mosaic_0001>

<bundles_post_ra>
// kernel: tpu_custom_call.1
= control target key start
LH: loop header
LB: loop body
LE: loop exit
PB: predicated region body
PF: predicated region fallthrough
CT: control target
= control target key end

     0   :  { %12 = vsyncpa [#allocation3], 0  ;;  %s3882_s0 = inlined_call_operand.vmem [shape: f32[8,64], index: 0, kind: input, shape index: {}]   ;;  %s3883_s1 = inlined_call_operand.hbm [shape: f32[64,128], index: 1, kind: input, shape index: {}]   ;;  %s3884_s2 = inlined_call_operand.vmem [shape: f32[1,128], index: 2, kind: input, shape index: {}]   ;;  %s3885_s3 = inlined_call_operand.vmem [shape: f32[128,128], index: 3, kind: input, shape index: {}]   ;;  %s3886_s4 = inlined_call_operand.vmem [shape: f32[1,128], index: 4, kind: input, shape index: {}]   ;;  %s3887_s5 = inlined_call_operand.vmem [shape: f32[128,16], index: 5, kind: input, shape index: {}]   ;;  %s3888_s6 = inlined_call_operand.vmem [shape: f32[1,16], index: 6, kind: input, shape index: {}]   ;;  %s3889_s7 = inlined_call_operand.hbm [shape: f32[8,16], index: 7, kind: output, shape index: {}]  }
   0x1   :  { %13 = vsyncpa [#allocation4], 0  ;;  %s2805_s24 = smov [#allocation2]  }
   0x2   :  { %s21_s25 = sshll.u32 %s2805_s24, 4  ;;  %s22_s25 = int_to_ptr.vmem [resolvable:$true] %s21_s25 }
   0x3   :  { %s2769_s26 = scalar_lea.vmem %s22_s25, 1024  ;;  %p2774_p1 = scmp.lt.s32.totalorder %s22_s25, %s22_s25 }
   0x4   :  { %p2770_p0 = scmp.ne.s32.totalorder %s22_s25, %s2769_s26  ;;  %p2775_p2 = scmp.lt.s32.totalorder %s2769_s26, %s2769_s26 }
   0x6   :  { %p2776_p3 = por %p2775_p2, %p2774_p1 }
   0x8   :  { %p2777_p4 = pnand %p2776_p3, %p2770_p0 }
   0xa   :  { %2780 = shalt.err (!%p2777_p4)
}
   0xb   :  { %s2806_s27 = smov 128   ;;  %s2807_s28 = smov 8  }
   0xc   :  { %27 = dma.hbm_to_vmem [thread:$0]  %s3883_s1, 1024, %s22_s25, [#allocation3], %s2806_s27, %s2806_s27, %s2807_s28  }
   0xd   :  { %2801 = dma.done.wait [#allocation3], 1024  }
   0xe   :  { %2802 = vsyncadd [#allocation3], 4294966272  ;;  %v2808_v0 = vmov 0.0   ;;  %vm2809_vm0 = vmmov 0   ;;  %v49_v1 = vld [vmem:[#allocation2 + $0x38] sm:$0xff]  ;;  %v48_v2 = vld [vmem:[#allocation2 + $0x30] sm:$0xff] }
   0xf   :  { %2217 = vmatprep.subr.mxu0 %v2808_v0  ;;  %2236 = vmatprep.subr.mxu1 %v2808_v0  ;;  %v47_v3 = vld [vmem:[#allocation2 + $0x28] sm:$0xff]  ;;  %vm57_vm1 = vcmask 523264   ;;  %v2860_v4 = vand.u32 4294901760, %v49_v1  ;;  %v2862_v5 = vand.u32 4294901760, %v48_v2  ;;  %v46_v7 = vld [vmem:[#allocation2 + $0x20] sm:$0xff]  ;;  %v45_v8 = vld [vmem:[#allocation2 + $0x18] sm:$0xff] }
  0x10   :  { %2233 = vmatprep.mubr.msk.f32.mxu0 %vm2809_vm0, %v2808_v0  ;;  %2252 = vmatprep.mubr.msk.f32.mxu1 %vm2809_vm0, %v2808_v0  ;;  %v2864_v6 = vand.u32 4294901760, %v47_v3  ;;  %v44_v9 = vld [vmem:[#allocation2 + $0x10] sm:$0xff]  ;;  %v2866_v10 = vand.u32 4294901760, %v46_v7  ;;  %v2868_v11 = vand.u32 4294901760, %v45_v8  ;;  %v43_v13 = vld [vmem:[#allocation2 + $0x8] sm:$0xff]  ;;  %v42_v14 = vld [vmem:[#allocation2] sm:$0xff] }
  0x11   :  { %v2870_v12 = vand.u32 4294901760, %v44_v9  ;;  %v41_v15 = vld [vmem:[%s3882_s0] sm:$0xff]  ;;  %2218 = vmatpush3.msra.mxu0 %v2860_v4  ;;  %v2877_v16 = vsub.f32 %v49_v1, %v2860_v4  ;;  %v2880_v17 = vsub.f32 %v48_v2, %v2862_v5  ;;  %v2882_v18 = vand.u32 4294901760, %v43_v13  ;;  %v614_v56 = vld [vmem:[%s3885_s3 + $0x78] sm:$0xff]  ;;  %v613_v58 = vld [vmem:[%s3885_s3 + $0x70] sm:$0xff] }
  0x12   :  { %v2885_v19 = vsub.f32 %v47_v3, %v2864_v6  ;;  %2219 = vmatprep.subr.mxu0 %v2808_v0  ;;  %v2888_v20 = vand.u32 4294901760, %v42_v14  ;;  %v2891_v21 = vsub.f32 %v46_v7, %v2866_v10  ;;  %v59_v22 = vsel %vm57_vm1, %v41_v15, 0  ;;  %v612_v61 = vld [vmem:[%s3885_s3 + $0x68] sm:$0xff]  ;;  %v611_v2 = vld [vmem:[%s3885_s3 + $0x60] sm:$0xff]  ;;  %v610_v7 = vld [vmem:[%s3885_s3 + $0x58] sm:$0xff] }
  0x13   :  { %v2895_v23 = vsub.f32 %v45_v8, %v2868_v11  ;;  %2220 = vmatpush3.msra.mxu0 %v2862_v5  ;;  %v163_v24 = vand.u32 4294901760, %v2877_v16  ;;  %v170_v25 = vand.u32 4294901760, %v2880_v17  ;;  %v2901_v27 = vand.u32 4294901760, %v59_v22 }
  0x14   :  { %v177_v26 = vand.u32 4294901760, %v2885_v19  ;;  %2221 = vmatprep.subr.mxu0 %v2808_v0  ;;  %v184_v28 = vand.u32 4294901760, %v2891_v21  ;;  %v2907_v30 = vsub.f32 %v44_v9, %v2870_v12  ;;  %v2910_v31 = vsub.f32 %v43_v13, %v2882_v18  ;;  %v609_v13 = vld [vmem:[%s3885_s3 + $0x50] sm:$0xff] }
  0x15   :  { %v191_v29 = vand.u32 4294901760, %v2895_v23  ;;  %2222 = vmatpush3.msra.mxu0 %v2864_v6  ;;  %v164_v32 = vsub.f32 %v2877_v16, %v163_v24  ;;  %v171_v33 = vsub.f32 %v2880_v17, %v170_v25  ;;  %v2923_v35 = vsub.f32 %v59_v22, %v2901_v27 }
  0x16   :  { %v178_v34 = vsub.f32 %v2885_v19, %v177_v26  ;;  %2223 = vmatprep.subr.mxu0 %v2808_v0  ;;  %v185_v36 = vsub.f32 %v2891_v21, %v184_v28  ;;  %v198_v40 = vand.u32 4294901760, %v2907_v30  ;;  %v205_v44 = vand.u32 4294901760, %v2910_v31 }
  0x17   :  { %2224 = vmatpush3.msra.mxu0 %v2866_v10  ;;  %v165_v37 = vand.u32 4294901760, %v164_v32  ;;  %v172_v38 = vand.u32 4294901760, %v171_v33  ;;  %v136_v39 = vand.u32 4294901760, %v2923_v35  ;;  %v192_v41 = vsub.f32 %v2895_v23, %v191_v29 }
  0x18   :  { %2225 = vmatprep.subr.mxu0 %v2808_v0  ;;  %v179_v42 = vand.u32 4294901760, %v178_v34  ;;  %v2942_v45 = vsub.f32 %v42_v14, %v2888_v20  ;;  %v186_v46 = vand.u32 4294901760, %v185_v36  ;;  %v199_v47 = vsub.f32 %v2907_v30, %v198_v40 }
  0x19   :  { %2226 = vmatpush3.msra.mxu0 %v2868_v11  ;;  %2237 = vmatpush3.msra.mxu1 %v165_v37  ;;  %v137_v43 = vsub.f32 %v2923_v35, %v136_v39  ;;  %v193_v50 = vand.u32 4294901760, %v192_v41  ;;  %v206_v51 = vsub.f32 %v2910_v31, %v205_v44  ;;  %v3062_v57 = vand.u32 4294901760, %v614_v56  ;;  %v605_v37 = vld [vmem:[%s3885_s3 + $0x30] sm:$0xff] }
  0x1a   :  { %2227 = vmatprep.subr.mxu0 %v2808_v0  ;;  %2238 = vmatprep.subr.mxu1 %v2808_v0  ;;  %v212_v48 = vand.u32 4294901760, %v2942_v45  ;;  %v200_v52 = vand.u32 4294901760, %v199_v47  ;;  %v3070_v60 = vand.u32 4294901760, %v613_v58  ;;  %v3081_v1 = vand.u32 4294901760, %v612_v61 }
  0x1b   :  { %2228 = vmatpush3.msra.mxu0 %v2870_v12  ;;  %2239 = vmatpush3.msra.mxu1 %v172_v38  ;;  %v138_v49 = vand.u32 4294901760, %v137_v43  ;;  %v207_v54 = vand.u32 4294901760, %v206_v51  ;;  %v3068_v59 = vsub.f32 %v614_v56, %v3062_v57  ;;  %v604_v43 = vld [vmem:[%s3885_s3 + $0x28] sm:$0xff]  ;;  %vm1928_vm2 = vcmask 130048  }
  0x1c   :  { %2229 = vmatprep.subr.mxu0 %v2808_v0  ;;  %2240 = vmatprep.subr.mxu1 %v2808_v0  ;;  %v213_v53 = vsub.f32 %v2942_v45, %v212_v48  ;;  %v3079_v63 = vsub.f32 %v613_v58, %v3070_v60  ;;  %v3194_v47 = vand.u32 4294901760, %v604_v43 }
  0x1d   :  { %2230 = vmatpush3.msra.mxu0 %v2882_v18  ;;  %2241 = vmatpush3.msra.mxu1 %v179_v42  ;;  %v716_v62 = vand.u32 4294901760, %v3068_v59  ;;  %v3183_v42 = vand.u32 4294901760, %v605_v37 }
  0x1e   :  { %2231 = vmatprep.subr.mxu0 %v2808_v0  ;;  %2242 = vmatprep.subr.mxu1 %v2808_v0  ;;  %v214_v55 = vand.u32 4294901760, %v213_v53 }
  0x1f   :  { %2232 = vmatpush3.msra.mxu0 %v2888_v20  ;;  %2243 = vmatpush3.msra.mxu1 %v186_v46  ;;  %v717_v3 = vsub.f32 %v3068_v59, %v716_v62 }
  0x20   :  { %2244 = vmatprep.subr.mxu1 %v2808_v0  ;;  %2255 = vmatprep.subr.mxu0 %v2808_v0 }
  0x21   :  { %2234 = vmatmul.mubr.f32.vlgmr.msra.gmra.mxu0 %v138_v49  ;;  %2245 = vmatpush3.msra.mxu1 %v193_v50  ;;  %v718_v8 = vand.u32 4294901760, %v717_v3  ;;  %v603_v49 = vld [vmem:[%s3885_s3 + $0x20] sm:$0xff] }
  0x22   :  { %2256 = vmatpush3.msra.mxu0 %v2877_v16  ;;  %2246 = vmatprep.subr.mxu1 %v2808_v0  ;;  %v3211_v53 = vand.u32 4294901760, %v603_v49 }
  0x23   :  { %2257 = vmatprep.subr.mxu0 %v2808_v0  ;;  %2247 = vmatpush3.msra.mxu1 %v200_v52  ;;  %v3209_v52 = vsub.f32 %v604_v43, %v3194_v47 }
  0x24   :  { %2258 = vmatpush3.msra.mxu0 %v2880_v17  ;;  %2248 = vmatprep.subr.mxu1 %v2808_v0  ;;  %v3120_v17 = vand.u32 4294901760, %v609_v13 }
  0x25   :  { %2259 = vmatprep.subr.mxu0 %v2808_v0  ;;  %2249 = vmatpush3.msra.mxu1 %v207_v54  ;;  %v786_v58 = vand.u32 4294901760, %v3209_v52 }
  0x26   :  { %2260 = vmatpush3.msra.mxu0 %v2885_v19  ;;  %2250 = vmatprep.subr.mxu1 %v2808_v0  ;;  %v608_v19 = vld [vmem:[%s3885_s3 + $0x48] sm:$0xff]  ;;  %v3134_v22 = vsub.f32 %v609_v13, %v3120_v17 }
  0x27   :  { %2261 = vmatprep.subr.mxu0 %v2808_v0  ;;  %2251 = vmatpush3.msra.mxu1 %v214_v55  ;;  %v602_v55 = vld [vmem:[%s3885_s3 + $0x18] sm:$0xff] }
  0x28   :  { %2262 = vmatpush3.msra.mxu0 %v2891_v21  ;;  %2253 = vmatmul.mubr.f32.vlgmr.msra.gmra.mxu1 %v2901_v27 }
  0x29   :  { %2263 = vmatprep.subr.mxu0 %v2808_v0  ;;  %2274 = vmatprep.subr.mxu1 %v2808_v0 }
  0x2a   :  { %2264 = vmatpush3.msra.mxu0 %v2895_v23  ;;  %2275 = vmatpush3.msra.mxu1 %v2860_v4  ;;  %v3136_v23 = vand.u32 4294901760, %v608_v19 }
  0x2b   :  { %2265 = vmatprep.subr.mxu0 %v2808_v0  ;;  %2276 = vmatprep.subr.mxu1 %v2808_v0 }
  0x2c   :  { %2266 = vmatpush3.msra.mxu0 %v2907_v30  ;;  %2277 = vmatpush3.msra.mxu1 %v2862_v5 }
  0x2d   :  { %2267 = vmatprep.subr.mxu0 %v2808_v0  ;;  %2278 = vmatprep.subr.mxu1 %v2808_v0 }
  0x2e   :  { %2268 = vmatpush3.msra.mxu0 %v2910_v31  ;;  %2279 = vmatpush3.msra.mxu1 %v2864_v6  ;;  %v606_v31 = vld [vmem:[%s3885_s3 + $0x38] sm:$0xff] }
  0x2f   :  { %2269 = vmatprep.subr.mxu0 %v2808_v0  ;;  %2280 = vmatprep.subr.mxu1 %v2808_v0 }
  0x30   :  { %2270 = vmatpush3.msra.mxu0 %v2942_v45  ;;  %2271 = vmatprep.mubr.msk.f32.mxu0 %vm2809_vm0, %v2808_v0 }
  0x31   :  { %2281 = vmatpush3.msra.mxu1 %v2866_v10  ;;  %2272 = vmatmul.mubr.f32.vlgmr.msra.gmra.mxu0 %v2923_v35  ;;  %v3167_v35 = vand.u32 4294901760, %v606_v31 }
  0x32   :  { %2282 = vmatprep.subr.mxu1 %v2808_v0  ;;  %2293 = vmatprep.subr.mxu0 %v2808_v0 }
  0x33   :  { %2283 = vmatpush3.msra.mxu1 %v2868_v11  ;;  %2294 = vmatpush3.msra.mxu0 %v163_v24  ;;  %v3180_v41 = vsub.f32 %v606_v31, %v3167_v35  ;;  %v599_v31 = vld [vmem:[%s3885_s3] sm:$0xff] }
  0x34   :  { %2284 = vmatprep.subr.mxu1 %v2808_v0  ;;  %2295 = vmatprep.subr.mxu0 %v2808_v0 }
  0x35   :  { %2285 = vmatpush3.msra.mxu1 %v2870_v12  ;;  %2296 = vmatpush3.msra.mxu0 %v170_v25  ;;  %v607_v25 = vld [vmem:[%s3885_s3 + $0x40] sm:$0xff]  ;;  %v772_v46 = vand.u32 4294901760, %v3180_v41 }
  0x36   :  { %2286 = vmatprep.subr.mxu1 %v2808_v0  ;;  %2297 = vmatprep.subr.mxu0 %v2808_v0 }
  0x37   :  { %2287 = vmatpush3.msra.mxu1 %v2882_v18  ;;  %2298 = vmatpush3.msra.mxu0 %v177_v26  ;;  %v773_v51 = vsub.f32 %v3180_v41, %v772_v46 }
  0x38   :  { %2288 = vmatprep.subr.mxu1 %v2808_v0  ;;  %2299 = vmatprep.subr.mxu0 %v2808_v0 }
  0x39   :  { %2289 = vmatpush3.msra.mxu1 %v2888_v20  ;;  %2290 = vmatprep.mubr.msk.f32.mxu1 %vm2809_vm0, %v2808_v0  ;;  %v774_v56 = vand.u32 4294901760, %v773_v51 }
  0x3a   :  { %2300 = vmatpush3.msra.mxu0 %v184_v28  ;;  %2291 = vmatmul.mubr.f32.vlgmr.msra.gmra.mxu1 %v136_v39  ;;  %v3147_v28 = vsub.f32 %v608_v19, %v3136_v23  ;;  %v600_v19 = vld [vmem:[%s3885_s3 + $0x8] sm:$0xff] }
  0x3b   :  { %2301 = vmatprep.subr.mxu0 %v2808_v0  ;;  %2312 = vmatprep.subr.mxu1 %v2808_v0 }
  0x3c   :  { %2302 = vmatpush3.msra.mxu0 %v191_v29  ;;  %2313 = vmatpush3.msra.mxu1 %v2860_v4  ;;  %v723_v4 = vand.u32 4294901760, %v3079_v63  ;;  %v3149_v29 = vand.u32 4294901760, %v607_v25  ;;  %v758_v33 = vand.u32 4294901760, %v3147_v28 }
  0x3d   :  { %2303 = vmatprep.subr.mxu0 %v2808_v0  ;;  %2314 = vmatprep.subr.mxu1 %v2808_v0 }
  0x3e   :  { %2304 = vmatpush3.msra.mxu0 %v198_v40  ;;  %2315 = vmatpush3.msra.mxu1 %v2862_v5  ;;  %v3093_v5 = vsub.f32 %v612_v61, %v3081_v1  ;;  %v724_v9 = vsub.f32 %v3079_v63, %v723_v4  ;;  %v3165_v34 = vsub.f32 %v607_v25, %v3149_v29 }
  0x3f   :  { %2305 = vmatprep.subr.mxu0 %v2808_v0  ;;  %2316 = vmatprep.subr.mxu1 %v2808_v0  ;;  %v759_v39 = vsub.f32 %v3147_v28, %v758_v33  ;;  %v3222_v61 = vsub.f32 %v603_v49, %v3211_v53 }
  0x40   :  { %2306 = vmatpush3.msra.mxu0 %v205_v44  ;;  %2317 = vmatpush3.msra.mxu1 %v2864_v6  ;;  %v3095_v6 = vand.u32 4294901760, %v611_v2  ;;  %v725_v14 = vand.u32 4294901760, %v724_v9  ;;  %v765_v40 = vand.u32 4294901760, %v3165_v34 }
  0x41   :  { %2307 = vmatprep.subr.mxu0 %v2808_v0  ;;  %2318 = vmatprep.subr.mxu1 %v2808_v0  ;;  %v760_v44 = vand.u32 4294901760, %v759_v39  ;;  %v793_v9 = vand.u32 4294901760, %v3222_v61 }
  0x42   :  { %2308 = vmatpush3.msra.mxu0 %v212_v48  ;;  %2309 = vmatprep.mubr.msk.f32.mxu0 %vm2809_vm0, %v2808_v0  ;;  %v766_v45 = vsub.f32 %v3165_v34, %v765_v40  ;;  %v3198_v48 = vsub.f32 %v605_v37, %v3183_v42 }
  0x43   :  { %2319 = vmatpush3.msra.mxu1 %v2866_v10  ;;  %2310 = vmatmul.mubr.f32.vlgmr.msra.gmra.mxu0 %v2901_v27  ;;  %v730_v10 = vand.u32 4294901760, %v3093_v5 }
  0x44   :  { %2320 = vmatprep.subr.mxu1 %v2808_v0  ;;  %2328 = vmatprep.mubr.msk.f32.mxu1 %vm2809_vm0, %v2808_v0  ;;  %v767_v50 = vand.u32 4294901760, %v766_v45  ;;  %v779_v54 = vand.u32 4294901760, %v3198_v48 }
  0x45   :  { %2321 = vmatpush3.msra.mxu1 %v2868_v11  ;;  %2331 = vmatprep.subr.mxu0 %v2808_v0  ;;  %v3107_v11 = vsub.f32 %v611_v2, %v3095_v6  ;;  %v731_v15 = vsub.f32 %v3093_v5, %v730_v10  ;;  %v3224_v2 = vand.u32 4294901760, %v602_v55 }
  0x46   :  { %2322 = vmatprep.subr.mxu1 %v2808_v0  ;;  %2363 = vmatprep.mubr.msk.f32.mxu0 %vm2809_vm0, %v2808_v0  ;;  %v780_v3 = vsub.f32 %v3198_v48, %v779_v54 }
  0x47   :  { %2323 = vmatpush3.msra.mxu1 %v2870_v12  ;;  %2332 = vmatpush3.msra.mxu0 %v3062_v57  ;;  %v3110_v12 = vand.u32 4294901760, %v610_v7  ;;  %v737_v16 = vand.u32 4294901760, %v3107_v11  ;;  %v3240_v13 = vsub.f32 %v602_v55, %v3224_v2 }
  0x48   :  { %2324 = vmatprep.subr.mxu1 %v2808_v0  ;;  %2333 = vmatprep.subr.mxu0 %v2808_v0 }
  0x49   :  { %2325 = vmatpush3.msra.mxu1 %v2882_v18  ;;  %2334 = vmatpush3.msra.mxu0 %v3070_v60  ;;  %v3124_v18 = vsub.f32 %v610_v7, %v3110_v12  ;;  %v738_v21 = vsub.f32 %v3107_v11, %v737_v16  ;;  %v601_v7 = vld [vmem:[%s3885_s3 + $0x10] sm:$0xff]  ;;  %v3893_v25 = vand.u32 4294901760, %v3240_v13 }
  0x4a   :  { %2326 = vmatprep.subr.mxu1 %v2808_v0  ;;  %2335 = vmatprep.subr.mxu0 %v2808_v0 }
  0x4b   :  { %2327 = vmatpush3.msra.mxu1 %v2888_v20  ;;  %2336 = vmatpush3.msra.mxu0 %v3081_v1  ;;  %v732_v20 = vand.u32 4294901760, %v731_v15  ;;  %v744_v24 = vand.u32 4294901760, %v3124_v18  ;;  %v739_v26 = vand.u32 4294901760, %v738_v21  ;;  %v781_v15 = vand.u32 4294901760, %v780_v3 }
  0x4c   :  { %2329 = vmatmul.mubr.f32.vlgmr.msra.gmra.mxu1 %v2901_v27  ;;  %2366 = vmatprep.subr.mxu1 %v2808_v0  ;;  %v751_v27 = vand.u32 4294901760, %v3134_v22  ;;  %v794_v21 = vsub.f32 %v3222_v61, %v793_v9 }
  0x4d   :  { %2398 = vmatprep.mubr.msk.f32.mxu1 %vm2809_vm0, %v2808_v0  ;;  %2337 = vmatprep.subr.mxu0 %v2808_v0  ;;  %v745_v30 = vsub.f32 %v3124_v18, %v744_v24 }
  0x4e   :  { %2338 = vmatpush3.msra.mxu0 %v3095_v6  ;;  %2367 = vmatpush3.msra.mxu1 %v718_v8  ;;  %v752_v32 = vsub.f32 %v3134_v22, %v751_v27  ;;  %v787_v8 = vsub.f32 %v3209_v52, %v786_v58 }
  0x4f   :  { %2339 = vmatprep.subr.mxu0 %v2808_v0  ;;  %2368 = vmatprep.subr.mxu1 %v2808_v0  ;;  %v746_v36 = vand.u32 4294901760, %v745_v30  ;;  %v3258_v30 = vand.u32 4294901760, %v600_v19 }
  0x50   :  { %2340 = vmatpush3.msra.mxu0 %v3110_v12  ;;  %2369 = vmatpush3.msra.mxu1 %v725_v14  ;;  %v753_v38 = vand.u32 4294901760, %v752_v32  ;;  %v3242_v14 = vand.u32 4294901760, %v601_v7  ;;  %v795_v32 = vand.u32 4294901760, %v794_v21 }
  0x51   :  { %2341 = vmatprep.subr.mxu0 %v2808_v0  ;;  %2370 = vmatprep.subr.mxu1 %v2808_v0  ;;  %v3273_v39 = vsub.f32 %v600_v19, %v3258_v30 }
  0x52   :  { %2342 = vmatpush3.msra.mxu0 %v3120_v17  ;;  %2371 = vmatpush3.msra.mxu1 %v732_v20  ;;  %v788_v20 = vand.u32 4294901760, %v787_v8 }
  0x53   :  { %2343 = vmatprep.subr.mxu0 %v2808_v0  ;;  %2372 = vmatprep.subr.mxu1 %v2808_v0  ;;  %v3891_v49 = vand.u32 4294901760, %v3273_v39 }
  0x54   :  { %2344 = vmatpush3.msra.mxu0 %v3136_v23  ;;  %2373 = vmatpush3.msra.mxu1 %v739_v26  ;;  %v3255_v26 = vsub.f32 %v601_v7, %v3242_v14 }
  0x55   :  { %2345 = vmatprep.subr.mxu0 %v2808_v0  ;;  %2374 = vmatprep.subr.mxu1 %v2808_v0  ;;  %v815_v55 = vsub.f32 %v3273_v39, %v3891_v49 }
  0x56   :  { %2346 = vmatpush3.msra.mxu0 %v3149_v29  ;;  %2375 = vmatpush3.msra.mxu1 %v746_v36  ;;  %v801_v36 = vsub.f32 %v3240_v13, %v3893_v25  ;;  %v3892_v37 = vand.u32 4294901760, %v3255_v26 }
  0x57   :  { %2347 = vmatprep.subr.mxu0 %v2808_v0  ;;  %2376 = vmatprep.subr.mxu1 %v2808_v0  ;;  %v816_v3 = vand.u32 4294901760, %v815_v55 }
  0x58   :  { %2348 = vmatpush3.msra.mxu0 %v3167_v35  ;;  %2377 = vmatpush3.msra.mxu1 %v753_v38  ;;  %v3269_v38 = vand.u32 4294901760, %v599_v31  ;;  %v802_v43 = vand.u32 4294901760, %v801_v36 }
  0x59   :  { %2349 = vmatprep.subr.mxu0 %v2808_v0  ;;  %2378 = vmatprep.subr.mxu1 %v2808_v0 }
  0x5a   :  { %2350 = vmatpush3.msra.mxu0 %v3183_v42  ;;  %2379 = vmatpush3.msra.mxu1 %v760_v44  ;;  %v808_v44 = vsub.f32 %v3255_v26, %v3892_v37  ;;  %v3281_v45 = vsub.f32 %v599_v31, %v3269_v38 }
  0x5b   :  { %2351 = vmatprep.subr.mxu0 %v2808_v0  ;;  %2380 = vmatprep.subr.mxu1 %v2808_v0 }
  0x5c   :  { %2352 = vmatpush3.msra.mxu0 %v3194_v47  ;;  %2381 = vmatpush3.msra.mxu1 %v767_v50  ;;  %v809_v50 = vand.u32 4294901760, %v808_v44  ;;  %v3890_v51 = vand.u32 4294901760, %v3281_v45 }
  0x5d   :  { %2353 = vmatprep.subr.mxu0 %v2808_v0  ;;  %2382 = vmatprep.subr.mxu1 %v2808_v0 }
  0x5e   :  { %2354 = vmatpush3.msra.mxu0 %v3211_v53  ;;  %2383 = vmatpush3.msra.mxu1 %v774_v56  ;;  %v822_v56 = vsub.f32 %v3281_v45, %v3890_v51 }
  0x5f   :  { %2355 = vmatprep.subr.mxu0 %v2808_v0  ;;  %2384 = vmatprep.subr.mxu1 %v2808_v0 }
  0x60   :  { %2356 = vmatpush3.msra.mxu0 %v3224_v2  ;;  %2385 = vmatpush3.msra.mxu1 %v781_v15  ;;  %v823_v7 = vand.u32 4294901760, %v822_v56 }
  0x61   :  { %2357 = vmatprep.subr.mxu0 %v2808_v0  ;;  %2386 = vmatprep.subr.mxu1 %v2808_v0 }
  0x62   :  { %2358 = vmatpush3.msra.mxu0 %v3242_v14  ;;  %2387 = vmatpush3.msra.mxu1 %v788_v20 }
  0x63   :  { %2359 = vmatprep.subr.mxu0 %v2808_v0  ;;  %2388 = vmatprep.subr.mxu1 %v2808_v0 }
  0x64   :  { %2360 = vmatpush3.msra.mxu0 %v3258_v30  ;;  %2389 = vmatpush3.msra.mxu1 %v795_v32 }
  0x65   :  { %2361 = vmatprep.subr.mxu0 %v2808_v0  ;;  %2390 = vmatprep.subr.mxu1 %v2808_v0 }
  0x66   :  { %2362 = vmatpush3.msra.mxu0 %v3269_v38  ;;  %2391 = vmatpush3.msra.mxu1 %v802_v43  ;;  %v1956_v43 = vld [vmem:[%s3884_s2] ss:$0 sm:$0xff] }
  0x67   :  { %2401 = vmatprep.subr.mxu0 %v2808_v0  ;;  %2392 = vmatprep.subr.mxu1 %v2808_v0 }
  0x68   :  { %2393 = vmatpush3.msra.mxu1 %v809_v50 }
  0x69   :  { %2394 = vmatprep.subr.mxu1 %v2808_v0 }
  0x6a   :  { %2395 = vmatpush3.msra.mxu1 %v816_v3 }
  0x6b   :  { %2396 = vmatprep.subr.mxu1 %v2808_v0 }
  0x6c   :  { %2397 = vmatpush3.msra.mxu1 %v823_v7 }
  0x6d   :  { %2436 = vmatprep.subr.mxu1 %v2808_v0 }
  0xe1   :  { %v140_v8 = vpop.f32.mrf.mxu0 }
  0xe2   :  { %v141_v44 = vadd.f32 %v1956_v43, %v140_v8 }
  0xe3   :  { %v2235_v15 = vpop.f32.mrf.mxu0 }
  0xe8   :  { %v251_v19 = vpop.f32.mrf.mxu1 }
  0xe9   :  { %v252_v55 = vadd.f32 %v251_v19, %v141_v44 }
  0xea   :  { %v2254_v20 = vpop.f32.mrf.mxu1 }
  0xf1   :  { %v339_v21 = vpop.f32.mrf.mxu0 }
  0xf2   :  { %v340_v3 = vadd.f32 %v339_v21, %v252_v55 }
  0xf3   :  { %v2273_v31 = vpop.f32.mrf.mxu0 }
  0xfa   :  { %v420_v32 = vpop.f32.mrf.mxu1 }
  0xfb   :  { %v421_v7 = vadd.f32 %v420_v32, %v340_v3  ;;  %v1271_v32 = vld [vmem:[%s3887_s5 + $0x38] sm:$0xff] }
  0xfc   :  { %v2292_v36 = vpop.f32.mrf.mxu1  ;;  %v3585_v44 = vand.u32 4294901760, %v1271_v32 }
 0x103   :  { %v515_v50 = vpop.f32.mrf.mxu0 }
 0x104   :  { %v516_v51 = vadd.f32 %v515_v50, %v421_v7  ;;  %v1270_v50 = vld [vmem:[%s3887_s5 + $0x30] sm:$0xff]  ;;  %v1269_v7 = vld [vmem:[%s3887_s5 + $0x28] sm:$0xff] }
 0x105   :  { %v2311_v56 = vpop.f32.mrf.mxu0  ;;  %v3596_v3 = vand.u32 4294901760, %v1270_v50 }
 0x106   :  { %v3594_v56 = vsub.f32 %v1271_v32, %v3585_v44 }
 0x10c   :  { %v594_v49 = vpop.f32.mrf.mxu1 }
 0x10d   :  { %v595_v37 = vadd.f32 %v594_v49, %v516_v51 }
 0x10e   :  { %v2330_v15 = vpop.f32.mrf.mxu1 }
 0x10f   :  { %v598_v25 = vmax.f32 %v595_v37, 0.0 }
 0x111   :  { %v3302_v20 = vand.u32 4294901760, %v598_v25 }
 0x113   :  { %v3305_v31 = vsub.f32 %v598_v25, %v3302_v20  ;;  %2399 = vmatmul.mubr.f32.vlgmr.msra.gmra.mxu1 %v3302_v20 }
 0x114   :  { %2437 = vmatpush3.msra.mxu1 %v3062_v57  ;;  %2468 = vmatprep.mubr.msk.f32.mxu1 %vm2809_vm0, %v2808_v0 }
 0x115   :  { %v705_v8 = vand.u32 4294901760, %v3305_v31  ;;  %2438 = vmatprep.subr.mxu1 %v2808_v0 }
 0x116   :  { %2439 = vmatpush3.msra.mxu1 %v3070_v60 }
 0x117   :  { %v706_v37 = vsub.f32 %v3305_v31, %v705_v8  ;;  %2440 = vmatprep.subr.mxu1 %v2808_v0 }
 0x118   :  { %2441 = vmatpush3.msra.mxu1 %v3081_v1 }
 0x119   :  { %2442 = vmatprep.subr.mxu1 %v2808_v0  ;;  %v707_v25 = vand.u32 4294901760, %v706_v37  ;;  %v1268_v37 = vld [vmem:[%s3887_s5 + $0x20] sm:$0xff] }
 0x11a   :  { %2443 = vmatpush3.msra.mxu1 %v3095_v6 }
 0x11b   :  { %2444 = vmatprep.subr.mxu1 %v2808_v0  ;;  %2364 = vmatmul.mubr.f32.vlgmr.msra.gmra.mxu0 %v707_v25 }
 0x11c   :  { %2402 = vmatpush3.msra.mxu0 %v3068_v59  ;;  %2445 = vmatpush3.msra.mxu1 %v3110_v12  ;;  %v3899_v59 = vand.u32 4294901760, %v3255_v26 }
 0x11d   :  { %2403 = vmatprep.subr.mxu0 %v2808_v0  ;;  %2446 = vmatprep.subr.mxu1 %v2808_v0 }
 0x11e   :  { %2404 = vmatpush3.msra.mxu0 %v3079_v63  ;;  %2447 = vmatpush3.msra.mxu1 %v3120_v17  ;;  %v1279_v63 = vld [vmem:[%s3887_s5 + $0x78] sm:$0xff] }
 0x11f   :  { %2405 = vmatprep.subr.mxu0 %v2808_v0  ;;  %2448 = vmatprep.subr.mxu1 %v2808_v0 }
 0x120   :  { %2406 = vmatpush3.msra.mxu0 %v3093_v5  ;;  %2449 = vmatpush3.msra.mxu1 %v3136_v23 }
 0x121   :  { %2407 = vmatprep.subr.mxu0 %v2808_v0  ;;  %2450 = vmatprep.subr.mxu1 %v2808_v0 }
 0x122   :  { %2408 = vmatpush3.msra.mxu0 %v3107_v11  ;;  %2451 = vmatpush3.msra.mxu1 %v3149_v29  ;;  %v1276_v11 = vld [vmem:[%s3887_s5 + $0x60] sm:$0xff] }
 0x123   :  { %2409 = vmatprep.subr.mxu0 %v2808_v0  ;;  %2452 = vmatprep.subr.mxu1 %v2808_v0 }
 0x124   :  { %2410 = vmatpush3.msra.mxu0 %v3124_v18  ;;  %2453 = vmatpush3.msra.mxu1 %v3167_v35 }
 0x125   :  { %2411 = vmatprep.subr.mxu0 %v2808_v0  ;;  %2454 = vmatprep.subr.mxu1 %v2808_v0 }
 0x126   :  { %2412 = vmatpush3.msra.mxu0 %v3134_v22  ;;  %2455 = vmatpush3.msra.mxu1 %v3183_v42  ;;  %v1274_v22 = vld [vmem:[%s3887_s5 + $0x50] sm:$0xff] }
 0x127   :  { %2413 = vmatprep.subr.mxu0 %v2808_v0  ;;  %2456 = vmatprep.subr.mxu1 %v2808_v0 }
 0x128   :  { %2414 = vmatpush3.msra.mxu0 %v3147_v28  ;;  %2457 = vmatpush3.msra.mxu1 %v3194_v47 }
 0x129   :  { %2415 = vmatprep.subr.mxu0 %v2808_v0  ;;  %2458 = vmatprep.subr.mxu1 %v2808_v0 }
 0x12a   :  { %2416 = vmatpush3.msra.mxu0 %v3165_v34  ;;  %2459 = vmatpush3.msra.mxu1 %v3211_v53 }
 0x12b   :  { %2417 = vmatprep.subr.mxu0 %v2808_v0  ;;  %2460 = vmatprep.subr.mxu1 %v2808_v0 }
 0x12c   :  { %2418 = vmatpush3.msra.mxu0 %v3180_v41  ;;  %2461 = vmatpush3.msra.mxu1 %v3224_v2 }
 0x12d   :  { %2419 = vmatprep.subr.mxu0 %v2808_v0  ;;  %2462 = vmatprep.subr.mxu1 %v2808_v0 }
 0x12e   :  { %2420 = vmatpush3.msra.mxu0 %v3198_v48  ;;  %2463 = vmatpush3.msra.mxu1 %v3242_v14 }
 0x12f   :  { %2421 = vmatprep.subr.mxu0 %v2808_v0  ;;  %2464 = vmatprep.subr.mxu1 %v2808_v0 }
 0x130   :  { %2422 = vmatpush3.msra.mxu0 %v3209_v52  ;;  %2465 = vmatpush3.msra.mxu1 %v3258_v30 }
 0x131   :  { %2423 = vmatprep.subr.mxu0 %v2808_v0  ;;  %2466 = vmatprep.subr.mxu1 %v2808_v0 }
 0x132   :  { %2424 = vmatpush3.msra.mxu0 %v3222_v61  ;;  %2467 = vmatpush3.msra.mxu1 %v3269_v38 }
 0x133   :  { %2425 = vmatprep.subr.mxu0 %v2808_v0  ;;  %2469 = vmatmul.mubr.f32.vlgmr.msra.gmra.mxu1 %v705_v8  ;;  %v3608_v8 = vand.u32 4294901760, %v1269_v7 }
 0x134   :  { %2506 = vmatprep.subr.mxu1 %v2808_v0  ;;  %2426 = vmatpush3.msra.mxu0 %v3240_v13 }
 0x135   :  { %2507 = vmatpush3.msra.mxu1 %v3062_v57  ;;  %2427 = vmatprep.subr.mxu0 %v2808_v0  ;;  %v3898_v57 = vand.u32 4294901760, %v3240_v13 }
 0x136   :  { %2508 = vmatprep.subr.mxu1 %v2808_v0  ;;  %2428 = vmatpush3.msra.mxu0 %v3255_v26 }
 0x137   :  { %2509 = vmatpush3.msra.mxu1 %v3070_v60  ;;  %2429 = vmatprep.subr.mxu0 %v2808_v0  ;;  %v3900_v60 = vand.u32 4294901760, %v3273_v39 }
 0x138   :  { %2510 = vmatprep.subr.mxu1 %v2808_v0  ;;  %2430 = vmatpush3.msra.mxu0 %v3273_v39 }
 0x139   :  { %2511 = vmatpush3.msra.mxu1 %v3081_v1  ;;  %2431 = vmatprep.subr.mxu0 %v2808_v0  ;;  %v3472_v1 = vand.u32 4294901760, %v1279_v63 }
 0x13a   :  { %2512 = vmatprep.subr.mxu1 %v2808_v0  ;;  %2432 = vmatpush3.msra.mxu0 %v3281_v45 }
 0x13b   :  { %2433 = vmatprep.mubr.msk.f32.mxu0 %vm2809_vm0, %v2808_v0  ;;  %2513 = vmatpush3.msra.mxu1 %v3095_v6  ;;  %v3478_v5 = vsub.f32 %v1279_v63, %v3472_v1 }
 0x13c   :  { %2434 = vmatmul.mubr.f32.vlgmr.msra.gmra.mxu0 %v3305_v31  ;;  %2471 = vmatprep.subr.mxu0 %v2808_v0  ;;  %v3606_v31 = vsub.f32 %v1270_v50, %v3596_v3 }
 0x13d   :  { %2514 = vmatprep.subr.mxu1 %v2808_v0  ;;  %2472 = vmatpush3.msra.mxu0 %v716_v62  ;;  %v3901_v62 = vand.u32 4294901760, %v3281_v45 }
 0x13e   :  { %2515 = vmatpush3.msra.mxu1 %v3110_v12  ;;  %2473 = vmatprep.subr.mxu0 %v2808_v0  ;;  %v1275_v12 = vld [vmem:[%s3887_s5 + $0x58] sm:$0xff] }
 0x13f   :  { %2516 = vmatprep.subr.mxu1 %v2808_v0  ;;  %2474 = vmatpush3.msra.mxu0 %v723_v4  ;;  %v1278_v4 = vld [vmem:[%s3887_s5 + $0x70] sm:$0xff]  ;;  %v3496_v18 = vand.u32 4294901760, %v1275_v12 }
 0x140   :  { %2517 = vmatpush3.msra.mxu1 %v3120_v17  ;;  %2475 = vmatprep.subr.mxu0 %v2808_v0  ;;  %v3480_v6 = vand.u32 4294901760, %v1278_v4  ;;  %v3494_v17 = vand.u32 4294901760, %v1276_v11 }
 0x141   :  { %2518 = vmatprep.subr.mxu1 %v2808_v0  ;;  %2476 = vmatpush3.msra.mxu0 %v730_v10  ;;  %v1277_v10 = vld [vmem:[%s3887_s5 + $0x68] sm:$0xff] }
 0x142   :  { %2519 = vmatpush3.msra.mxu1 %v3136_v23  ;;  %2477 = vmatprep.subr.mxu0 %v2808_v0  ;;  %v1273_v23 = vld [vmem:[%s3887_s5 + $0x48] sm:$0xff]  ;;  %v3510_v28 = vsub.f32 %v1278_v4, %v3480_v6 }
 0x143   :  { %2520 = vmatprep.subr.mxu1 %v2808_v0  ;;  %2478 = vmatpush3.msra.mxu0 %v737_v16  ;;  %v3492_v16 = vand.u32 4294901760, %v1277_v10 }
 0x144   :  { %2521 = vmatpush3.msra.mxu1 %v3149_v29  ;;  %2479 = vmatprep.subr.mxu0 %v2808_v0  ;;  %v3513_v29 = vand.u32 4294901760, %v1274_v22 }
 0x145   :  { %2522 = vmatprep.subr.mxu1 %v2808_v0  ;;  %2480 = vmatpush3.msra.mxu0 %v744_v24  ;;  %v1272_v24 = vld [vmem:[%s3887_s5 + $0x40] sm:$0xff]  ;;  %v3518_v34 = vsub.f32 %v1277_v10, %v3492_v16 }
 0x146   :  { %2523 = vmatpush3.msra.mxu1 %v3167_v35  ;;  %2481 = vmatprep.subr.mxu0 %v2808_v0  ;;  %v3521_v35 = vsub.f32 %v1276_v11, %v3494_v17  ;;  %v3527_v41 = vand.u32 4294901760, %v1272_v24 }
 0x147   :  { %2524 = vmatprep.subr.mxu1 %v2808_v0  ;;  %2482 = vmatpush3.msra.mxu0 %v751_v27  ;;  %v1381_v27 = vand.u32 4294901760, %v3478_v5  ;;  %v1395_v52 = vand.u32 4294901760, %v3518_v34 }
 0x148   :  { %2525 = vmatpush3.msra.mxu1 %v3183_v42  ;;  %2483 = vmatprep.subr.mxu0 %v2808_v0 }
 0x149   :  { %2526 = vmatprep.subr.mxu1 %v2808_v0  ;;  %2484 = vmatpush3.msra.mxu0 %v758_v33  ;;  %v3515_v33 = vand.u32 4294901760, %v1273_v23  ;;  %v1382_v42 = vsub.f32 %v3478_v5, %v1381_v27  ;;  %v1396_v13 = vsub.f32 %v3518_v34, %v1395_v52 }
 0x14a   :  { %2527 = vmatpush3.msra.mxu1 %v3194_v47  ;;  %2485 = vmatprep.subr.mxu0 %v2808_v0  ;;  %v3534_v47 = vsub.f32 %v1274_v22, %v3513_v29  ;;  %v1266_v22 = vld [vmem:[%s3887_s5 + $0x10] sm:$0xff] }
 0x14b   :  { %2528 = vmatprep.subr.mxu1 %v2808_v0  ;;  %2486 = vmatpush3.msra.mxu0 %v765_v40  ;;  %v3524_v40 = vsub.f32 %v1275_v12, %v3496_v18  ;;  %v3538_v48 = vsub.f32 %v1273_v23, %v3515_v33  ;;  %v1397_v39 = vand.u32 4294901760, %v1396_v13  ;;  %v1265_v13 = vld [vmem:[%s3887_s5 + $0x8] sm:$0xff] }
 0x14c   :  { %2529 = vmatpush3.msra.mxu1 %v3211_v53  ;;  %2487 = vmatprep.subr.mxu0 %v2808_v0  ;;  %v1402_v53 = vand.u32 4294901760, %v3521_v35 }
 0x14d   :  { %2530 = vmatprep.subr.mxu1 %v2808_v0  ;;  %2488 = vmatpush3.msra.mxu0 %v772_v46  ;;  %v1388_v46 = vand.u32 4294901760, %v3510_v28 }
 0x14e   :  { %2531 = vmatpush3.msra.mxu1 %v3224_v2  ;;  %2489 = vmatprep.subr.mxu0 %v2808_v0  ;;  %v1416_v2 = vand.u32 4294901760, %v3534_v47 }
 0x14f   :  { %2532 = vmatprep.subr.mxu1 %v2808_v0  ;;  %2490 = vmatpush3.msra.mxu0 %v779_v54  ;;  %v1409_v54 = vand.u32 4294901760, %v3524_v40  ;;  %v1389_v61 = vsub.f32 %v3510_v28, %v1388_v46 }
 0x150   :  { %2533 = vmatpush3.msra.mxu1 %v3242_v14  ;;  %2491 = vmatprep.subr.mxu0 %v2808_v0  ;;  %v1403_v14 = vsub.f32 %v3521_v35, %v1402_v53  ;;  %v1417_v49 = vsub.f32 %v3534_v47, %v1416_v2 }
 0x151   :  { %2534 = vmatprep.subr.mxu1 %v2808_v0  ;;  %2492 = vmatpush3.msra.mxu0 %v786_v58  ;;  %v1383_v58 = vand.u32 4294901760, %v1382_v42  ;;  %v1390_v26 = vand.u32 4294901760, %v1389_v61 }
 0x152   :  { %2535 = vmatpush3.msra.mxu1 %v3258_v30  ;;  %2493 = vmatprep.subr.mxu0 %v2808_v0  ;;  %v1410_v30 = vsub.f32 %v3524_v40, %v1409_v54  ;;  %v1404_v45 = vand.u32 4294901760, %v1403_v14  ;;  %v1418_v36 = vand.u32 4294901760, %v1417_v49  ;;  %v1264_v49 = vld [vmem:[%s3887_s5] sm:$0xff] }
 0x153   :  { %2536 = vmatprep.subr.mxu1 %v2808_v0  ;;  %2494 = vmatpush3.msra.mxu0 %v793_v9  ;;  %v3550_v9 = vsub.f32 %v1272_v24, %v3527_v41 }
 0x154   :  { %2537 = vmatpush3.msra.mxu1 %v3269_v38  ;;  %2538 = vmatprep.mubr.msk.f32.mxu1 %vm2809_vm0, %v2808_v0  ;;  %v1423_v38 = vand.u32 4294901760, %v3538_v48  ;;  %v1411_v19 = vand.u32 4294901760, %v1410_v30 }
 0x155   :  { %2495 = vmatprep.subr.mxu0 %v2808_v0  ;;  %2539 = vmatmul.mubr.f32.vlgmr.msra.gmra.mxu1 %v3302_v20  ;;  %v1430_v51 = vand.u32 4294901760, %v3550_v9 }
 0x156   :  { %2496 = vmatpush3.msra.mxu0 %v3898_v57  ;;  %2503 = vmatprep.mubr.msk.f32.mxu0 %vm2809_vm0, %v2808_v0  ;;  %v1424_v21 = vsub.f32 %v3538_v48, %v1423_v38  ;;  %v1444_v57 = vand.u32 4294901760, %v3606_v31 }
 0x157   :  { %2497 = vmatprep.subr.mxu0 %v2808_v0  ;;  %2576 = vmatprep.subr.mxu1 %v2808_v0  ;;  %v1431_v43 = vsub.f32 %v3550_v9, %v1430_v51 }
 0x158   :  { %2498 = vmatpush3.msra.mxu0 %v3899_v59  ;;  %2608 = vmatprep.mubr.msk.f32.mxu1 %vm2809_vm0, %v2808_v0  ;;  %v1425_v55 = vand.u32 4294901760, %v1424_v21  ;;  %v3621_v59 = vsub.f32 %v1269_v7, %v3608_v8  ;;  %v1445_v4 = vsub.f32 %v3606_v31, %v1444_v57 }
 0x159   :  { %2499 = vmatprep.subr.mxu0 %v2808_v0  ;;  %2577 = vmatpush3.msra.mxu1 %v1383_v58  ;;  %v1432_v15 = vand.u32 4294901760, %v1431_v43  ;;  %v3650_v58 = vand.u32 4294901760, %v1266_v22 }
 0x15a   :  { %2500 = vmatpush3.msra.mxu0 %v3900_v60  ;;  %2578 = vmatprep.subr.mxu1 %v2808_v0  ;;  %v3623_v60 = vand.u32 4294901760, %v1268_v37  ;;  %v1451_v10 = vand.u32 4294901760, %v3621_v59  ;;  %v1446_v23 = vand.u32 4294901760, %v1445_v4 }
 0x15b   :  { %2501 = vmatprep.subr.mxu0 %v2808_v0  ;;  %2579 = vmatpush3.msra.mxu1 %v1390_v26  ;;  %v3664_v30 = vsub.f32 %v1266_v22, %v3650_v58 }
 0x15c   :  { %2502 = vmatpush3.msra.mxu0 %v3901_v62  ;;  %2580 = vmatprep.subr.mxu1 %v2808_v0  ;;  %v1267_v62 = vld [vmem:[%s3887_s5 + $0x18] sm:$0xff]  ;;  %v3636_v11 = vsub.f32 %v1268_v37, %v3623_v60  ;;  %v1452_v24 = vsub.f32 %v3621_v59, %v1451_v10 }
 0x15d   :  { %2504 = vmatmul.mubr.f32.vlgmr.msra.gmra.mxu0 %v3302_v20  ;;  %2541 = vmatprep.subr.mxu0 %v2808_v0  ;;  %v1437_v20 = vand.u32 4294901760, %v3594_v56  ;;  %v3640_v12 = vand.u32 4294901760, %v1267_v62  ;;  %v3896_v21 = vand.u32 4294901760, %v3664_v30 }
 0x15e   :  { %2573 = vmatprep.mubr.msk.f32.mxu0 %vm2809_vm0, %v2808_v0  ;;  %2542 = vmatpush3.msra.mxu0 %v3472_v1  ;;  %v1458_v42 = vand.u32 4294901760, %v3636_v11  ;;  %v1453_v14 = vand.u32 4294901760, %v1452_v24 }
 0x15f   :  { %2543 = vmatprep.subr.mxu0 %v2808_v0  ;;  %2581 = vmatpush3.msra.mxu1 %v1397_v39  ;;  %v1438_v25 = vsub.f32 %v3594_v56, %v1437_v20  ;;  %v3654_v61 = vsub.f32 %v1267_v62, %v3640_v12  ;;  %v3666_v39 = vand.u32 4294901760, %v1265_v13  ;;  %v1473_v50 = vsub.f32 %v3664_v30, %v3896_v21 }
 0x160   :  { %2544 = vmatpush3.msra.mxu0 %v3480_v6  ;;  %2582 = vmatprep.subr.mxu1 %v2808_v0  ;;  %v1459_v26 = vsub.f32 %v3636_v11, %v1458_v42 }
 0x161   :  { %2545 = vmatprep.subr.mxu0 %v2808_v0  ;;  %2583 = vmatpush3.msra.mxu1 %v1404_v45  ;;  %v1439_v63 = vand.u32 4294901760, %v1438_v25  ;;  %v3897_v45 = vand.u32 4294901760, %v3654_v61  ;;  %v3677_v32 = vsub.f32 %v1265_v13, %v3666_v39  ;;  %v1474_v37 = vand.u32 4294901760, %v1473_v50  ;;  %v1957_v50 = vld [vmem:[%s3886_s4] ss:$0 sm:$0xff] }
 0x162   :  { %2546 = vmatpush3.msra.mxu0 %v3492_v16  ;;  %2584 = vmatprep.subr.mxu1 %v2808_v0 }
 0x163   :  { %2547 = vmatprep.subr.mxu0 %v2808_v0  ;;  %2585 = vmatpush3.msra.mxu1 %v1411_v19  ;;  %v1460_v19 = vand.u32 4294901760, %v1459_v26  ;;  %v1466_v43 = vsub.f32 %v3654_v61, %v3897_v45 }
 0x164   :  { %2548 = vmatpush3.msra.mxu0 %v3494_v17  ;;  %2586 = vmatprep.subr.mxu1 %v2808_v0 }
 0x165   :  { %2549 = vmatprep.subr.mxu0 %v2808_v0  ;;  %2587 = vmatpush3.msra.mxu1 %v1418_v36  ;;  %v3679_v36 = vand.u32 4294901760, %v1264_v49 }
 0x166   :  { %2550 = vmatpush3.msra.mxu0 %v3496_v18  ;;  %2588 = vmatprep.subr.mxu1 %v2808_v0 }
 0x167   :  { %2551 = vmatprep.subr.mxu0 %v2808_v0  ;;  %2589 = vmatpush3.msra.mxu1 %v1425_v55  ;;  %v3895_v55 = vand.u32 4294901760, %v3677_v32  ;;  %v3692_v7 = vsub.f32 %v1264_v49, %v3679_v36 }
 0x168   :  { %2552 = vmatpush3.msra.mxu0 %v3513_v29  ;;  %2590 = vmatprep.subr.mxu1 %v2808_v0 }
 0x169   :  { %2553 = vmatprep.subr.mxu0 %v2808_v0  ;;  %2591 = vmatpush3.msra.mxu1 %v1432_v15  ;;  %v1467_v15 = vand.u32 4294901760, %v1466_v43  ;;  %v1480_v25 = vsub.f32 %v3677_v32, %v3895_v55  ;;  %v3894_v62 = vand.u32 4294901760, %v3692_v7 }
 0x16a   :  { %2554 = vmatpush3.msra.mxu0 %v3515_v33  ;;  %2592 = vmatprep.subr.mxu1 %v2808_v0 }
 0x16b   :  { %2555 = vmatprep.subr.mxu0 %v2808_v0  ;;  %2593 = vmatpush3.msra.mxu1 %v1439_v63  ;;  %v1481_v63 = vand.u32 4294901760, %v1480_v25  ;;  %v1487_v4 = vsub.f32 %v3692_v7, %v3894_v62 }
 0x16c   :  { %2556 = vmatpush3.msra.mxu0 %v3527_v41  ;;  %2594 = vmatprep.subr.mxu1 %v2808_v0 }
 0x16d   :  { %2557 = vmatprep.subr.mxu0 %v2808_v0  ;;  %2595 = vmatpush3.msra.mxu1 %v1446_v23  ;;  %v1488_v22 = vand.u32 4294901760, %v1487_v4 }
 0x16e   :  { %2558 = vmatpush3.msra.mxu0 %v3585_v44  ;;  %2596 = vmatprep.subr.mxu1 %v2808_v0 }
 0x16f   :  { %2559 = vmatprep.subr.mxu0 %v2808_v0  ;;  %2597 = vmatpush3.msra.mxu1 %v1453_v14 }
 0x170   :  { %2560 = vmatpush3.msra.mxu0 %v3596_v3  ;;  %2598 = vmatprep.subr.mxu1 %v2808_v0 }
 0x171   :  { %2561 = vmatprep.subr.mxu0 %v2808_v0  ;;  %2599 = vmatpush3.msra.mxu1 %v1460_v19 }
 0x172   :  { %2562 = vmatpush3.msra.mxu0 %v3608_v8  ;;  %2600 = vmatprep.subr.mxu1 %v2808_v0 }
 0x173   :  { %2563 = vmatprep.subr.mxu0 %v2808_v0  ;;  %2601 = vmatpush3.msra.mxu1 %v1467_v15 }
 0x174   :  { %2564 = vmatpush3.msra.mxu0 %v3623_v60  ;;  %2602 = vmatprep.subr.mxu1 %v2808_v0 }
 0x175   :  { %2565 = vmatprep.subr.mxu0 %v2808_v0  ;;  %2603 = vmatpush3.msra.mxu1 %v1474_v37 }
 0x176   :  { %2566 = vmatpush3.msra.mxu0 %v3640_v12  ;;  %2604 = vmatprep.subr.mxu1 %v2808_v0 }
 0x177   :  { %2567 = vmatprep.subr.mxu0 %v2808_v0  ;;  %2605 = vmatpush3.msra.mxu1 %v1481_v63 }
 0x178   :  { %2568 = vmatpush3.msra.mxu0 %v3650_v58  ;;  %2606 = vmatprep.subr.mxu1 %v2808_v0 }
 0x179   :  { %2569 = vmatprep.subr.mxu0 %v2808_v0  ;;  %2607 = vmatpush3.msra.mxu1 %v1488_v22 }
 0x17a   :  { %2570 = vmatpush3.msra.mxu0 %v3666_v39  ;;  %2646 = vmatprep.subr.mxu1 %v2808_v0 }
 0x17b   :  { %2571 = vmatprep.subr.mxu0 %v2808_v0 }
 0x17c   :  { %2572 = vmatpush3.msra.mxu0 %v3679_v36 }
 0x17d   :  { %2611 = vmatprep.subr.mxu0 %v2808_v0 }
 0x1d3   :  { %v860_v23 = vpop.f32.mrf.mxu1 }
 0x1d5   :  { %v2400_v24 = vpop.f32.mrf.mxu1 }
 0x1db   :  { %v709_v13 = vpop.f32.mrf.mxu0 }
 0x1dc   :  { %v710_v15 = vadd.f32 %v1957_v50, %v709_v13 }
 0x1dd   :  { %v2365_v14 = vpop.f32.mrf.mxu0 }
 0x1de   :  { %v861_v25 = vadd.f32 %v860_v23, %v710_v15 }
 0x1f3   :  { %v1053_v26 = vpop.f32.mrf.mxu1 }
 0x1f5   :  { %v2470_v49 = vpop.f32.mrf.mxu1 }
 0x1fc   :  { %v964_v19 = vpop.f32.mrf.mxu0 }
 0x1fd   :  { %v965_v4 = vadd.f32 %v964_v19, %v861_v25 }
 0x1fe   :  { %v2435_v43 = vpop.f32.mrf.mxu0 }
 0x1ff   :  { %v1054_v22 = vadd.f32 %v1053_v26, %v965_v4 }
 0x215   :  { %v1259_v37 = vpop.f32.mrf.mxu1 }
 0x217   :  { %v2540_v63 = vpop.f32.mrf.mxu1 }
 0x21d   :  { %v1172_v62 = vpop.f32.mrf.mxu0 }
 0x21e   :  { %v1173_v55 = vadd.f32 %v1172_v62, %v1054_v22 }
 0x21f   :  { %v2505_v21 = vpop.f32.mrf.mxu0 }
 0x220   :  { %v1260_v24 = vadd.f32 %v1259_v37, %v1173_v55 }
 0x222   :  { %v1263_v45 = vmax.f32 %v1260_v24, 0.0 }
 0x224   :  { %v3712_v14 = vand.u32 4294901760, %v1263_v45 }
 0x226   :  { %v3715_v49 = vsub.f32 %v1263_v45, %v3712_v14  ;;  %2609 = vmatmul.mubr.f32.vlgmr.msra.gmra.mxu1 %v3712_v14 }
 0x227   :  { %2647 = vmatpush3.msra.mxu1 %v3472_v1  ;;  %2678 = vmatprep.mubr.msk.f32.mxu1 %vm2809_vm0, %v2808_v0 }
 0x228   :  { %v1370_v23 = vand.u32 4294901760, %v3715_v49  ;;  %2648 = vmatprep.subr.mxu1 %v2808_v0 }
 0x229   :  { %2649 = vmatpush3.msra.mxu1 %v3480_v6 }
 0x22a   :  { %2650 = vmatprep.subr.mxu1 %v2808_v0  ;;  %v1371_v21 = vsub.f32 %v3715_v49, %v1370_v23 }
 0x22b   :  { %2651 = vmatpush3.msra.mxu1 %v3492_v16 }
 0x22c   :  { %2652 = vmatprep.subr.mxu1 %v2808_v0  ;;  %v1372_v45 = vand.u32 4294901760, %v1371_v21 }
 0x22d   :  { %2653 = vmatpush3.msra.mxu1 %v3494_v17 }
 0x22e   :  { %2654 = vmatprep.subr.mxu1 %v2808_v0  ;;  %2574 = vmatmul.mubr.f32.vlgmr.msra.gmra.mxu0 %v1372_v45 }
 0x22f   :  { %2612 = vmatpush3.msra.mxu0 %v3478_v5  ;;  %2655 = vmatpush3.msra.mxu1 %v3496_v18  ;;  %v3903_v5 = vand.u32 4294901760, %v3664_v30 }
 0x230   :  { %2613 = vmatprep.subr.mxu0 %v2808_v0  ;;  %2656 = vmatprep.subr.mxu1 %v2808_v0 }
 0x231   :  { %2614 = vmatpush3.msra.mxu0 %v3510_v28  ;;  %2657 = vmatpush3.msra.mxu1 %v3513_v29 }
 0x232   :  { %2615 = vmatprep.subr.mxu0 %v2808_v0  ;;  %2658 = vmatprep.subr.mxu1 %v2808_v0 }
 0x233   :  { %2616 = vmatpush3.msra.mxu0 %v3518_v34  ;;  %2659 = vmatpush3.msra.mxu1 %v3515_v33 }
 0x234   :  { %2617 = vmatprep.subr.mxu0 %v2808_v0  ;;  %2660 = vmatprep.subr.mxu1 %v2808_v0 }
 0x235   :  { %2618 = vmatpush3.msra.mxu0 %v3521_v35  ;;  %2661 = vmatpush3.msra.mxu1 %v3527_v41 }
 0x236   :  { %2619 = vmatprep.subr.mxu0 %v2808_v0  ;;  %2662 = vmatprep.subr.mxu1 %v2808_v0 }
 0x237   :  { %2620 = vmatpush3.msra.mxu0 %v3524_v40  ;;  %2663 = vmatpush3.msra.mxu1 %v3585_v44  ;;  %v1958_v40 = vld [vmem:[%s3888_s6] ss:$0 sm:$0xff]  ;;  %s2810_s6 = smov [#allocation5]  }
 0x238   :  { %2621 = vmatprep.subr.mxu0 %v2808_v0  ;;  %2664 = vmatprep.subr.mxu1 %v2808_v0  ;;  %s1947_s22 = sshll.u32 %s2810_s6, 4  ;;  %s1948_s22 = int_to_ptr.vmem [resolvable:$true] %s1947_s22 }
 0x239   :  { %2622 = vmatpush3.msra.mxu0 %v3534_v47  ;;  %2665 = vmatpush3.msra.mxu1 %v3596_v3  ;;  %s2781_s23 = scalar_lea.vmem %s1948_s22, 128  ;;  %p2786_p6 = scmp.lt.s32.totalorder %s1948_s22, %s1948_s22 }
 0x23a   :  { %2623 = vmatprep.subr.mxu0 %v2808_v0  ;;  %2666 = vmatprep.subr.mxu1 %v2808_v0  ;;  %p2782_p5 = scmp.ne.s32.totalorder %s1948_s22, %s2781_s23  ;;  %p2787_p7 = scmp.lt.s32.totalorder %s2781_s23, %s2781_s23 }
 0x23b   :  { %2624 = vmatpush3.msra.mxu0 %v3538_v48  ;;  %2667 = vmatpush3.msra.mxu1 %v3608_v8 }
 0x23c   :  { %2625 = vmatprep.subr.mxu0 %v2808_v0  ;;  %2668 = vmatprep.subr.mxu1 %v2808_v0  ;;  %p2788_p8 = por %p2787_p7, %p2786_p6 }
 0x23d   :  { %2626 = vmatpush3.msra.mxu0 %v3550_v9  ;;  %2669 = vmatpush3.msra.mxu1 %v3623_v60 }
 0x23e   :  { %2627 = vmatprep.subr.mxu0 %v2808_v0  ;;  %2670 = vmatprep.subr.mxu1 %v2808_v0  ;;  %p2789_p9 = pnand %p2788_p8, %p2782_p5 }
 0x23f   :  { %2628 = vmatpush3.msra.mxu0 %v3594_v56  ;;  %2671 = vmatpush3.msra.mxu1 %v3640_v12 }
 0x240   :  { %2629 = vmatprep.subr.mxu0 %v2808_v0  ;;  %2672 = vmatprep.subr.mxu1 %v2808_v0 }
 0x241   :  { %2630 = vmatpush3.msra.mxu0 %v3606_v31  ;;  %2673 = vmatpush3.msra.mxu1 %v3650_v58 }
 0x242   :  { %2631 = vmatprep.subr.mxu0 %v2808_v0  ;;  %2674 = vmatprep.subr.mxu1 %v2808_v0 }
 0x243   :  { %2632 = vmatpush3.msra.mxu0 %v3621_v59  ;;  %2675 = vmatpush3.msra.mxu1 %v3666_v39 }
 0x244   :  { %2633 = vmatprep.subr.mxu0 %v2808_v0  ;;  %2676 = vmatprep.subr.mxu1 %v2808_v0 }
 0x245   :  { %2634 = vmatpush3.msra.mxu0 %v3636_v11  ;;  %2677 = vmatpush3.msra.mxu1 %v3679_v36 }
 0x246   :  { %2635 = vmatprep.subr.mxu0 %v2808_v0  ;;  %2679 = vmatmul.mubr.f32.vlgmr.msra.gmra.mxu1 %v1370_v23 }
 0x247   :  { %2716 = vmatprep.subr.mxu1 %v2808_v0  ;;  %2636 = vmatpush3.msra.mxu0 %v3654_v61 }
 0x248   :  { %2717 = vmatpush3.msra.mxu1 %v3472_v1  ;;  %2637 = vmatprep.subr.mxu0 %v2808_v0  ;;  %v3902_v1 = vand.u32 4294901760, %v3654_v61 }
 0x249   :  { %2718 = vmatprep.subr.mxu1 %v2808_v0  ;;  %2638 = vmatpush3.msra.mxu0 %v3664_v30 }
 0x24a   :  { %2719 = vmatpush3.msra.mxu1 %v3480_v6  ;;  %2639 = vmatprep.subr.mxu0 %v2808_v0  ;;  %v3904_v6 = vand.u32 4294901760, %v3677_v32 }
 0x24b   :  { %2720 = vmatprep.subr.mxu1 %v2808_v0  ;;  %2640 = vmatpush3.msra.mxu0 %v3677_v32 }
 0x24c   :  { %2721 = vmatpush3.msra.mxu1 %v3492_v16  ;;  %2641 = vmatprep.subr.mxu0 %v2808_v0  ;;  %v3905_v16 = vand.u32 4294901760, %v3692_v7 }
 0x24d   :  { %2722 = vmatprep.subr.mxu1 %v2808_v0  ;;  %2642 = vmatpush3.msra.mxu0 %v3692_v7 }
 0x24e   :  { %2643 = vmatprep.mubr.msk.f32.mxu0 %vm2809_vm0, %v2808_v0  ;;  %2723 = vmatpush3.msra.mxu1 %v3494_v17 }
 0x24f   :  { %2644 = vmatmul.mubr.f32.vlgmr.msra.gmra.mxu0 %v3715_v49  ;;  %2681 = vmatprep.subr.mxu0 %v2808_v0 }
 0x250   :  { %2724 = vmatprep.subr.mxu1 %v2808_v0  ;;  %2682 = vmatpush3.msra.mxu0 %v1381_v27 }
 0x251   :  { %2725 = vmatpush3.msra.mxu1 %v3496_v18  ;;  %2683 = vmatprep.subr.mxu0 %v2808_v0 }
 0x252   :  { %2726 = vmatprep.subr.mxu1 %v2808_v0  ;;  %2684 = vmatpush3.msra.mxu0 %v1388_v46 }
 0x253   :  { %2727 = vmatpush3.msra.mxu1 %v3513_v29  ;;  %2685 = vmatprep.subr.mxu0 %v2808_v0 }
 0x254   :  { %2728 = vmatprep.subr.mxu1 %v2808_v0  ;;  %2686 = vmatpush3.msra.mxu0 %v1395_v52 }
 0x255   :  { %2729 = vmatpush3.msra.mxu1 %v3515_v33  ;;  %2687 = vmatprep.subr.mxu0 %v2808_v0 }
 0x256   :  { %2730 = vmatprep.subr.mxu1 %v2808_v0  ;;  %2688 = vmatpush3.msra.mxu0 %v1402_v53 }
 0x257   :  { %2731 = vmatpush3.msra.mxu1 %v3527_v41  ;;  %2689 = vmatprep.subr.mxu0 %v2808_v0 }
 0x258   :  { %2732 = vmatprep.subr.mxu1 %v2808_v0  ;;  %2690 = vmatpush3.msra.mxu0 %v1409_v54 }
 0x259   :  { %2733 = vmatpush3.msra.mxu1 %v3585_v44  ;;  %2691 = vmatprep.subr.mxu0 %v2808_v0 }
 0x25a   :  { %2734 = vmatprep.subr.mxu1 %v2808_v0  ;;  %2692 = vmatpush3.msra.mxu0 %v1416_v2 }
 0x25b   :  { %2735 = vmatpush3.msra.mxu1 %v3596_v3  ;;  %2693 = vmatprep.subr.mxu0 %v2808_v0 }
 0x25c   :  { %2736 = vmatprep.subr.mxu1 %v2808_v0  ;;  %2694 = vmatpush3.msra.mxu0 %v1423_v38 }
 0x25d   :  { %2737 = vmatpush3.msra.mxu1 %v3608_v8  ;;  %2695 = vmatprep.subr.mxu0 %v2808_v0 }
 0x25e   :  { %2738 = vmatprep.subr.mxu1 %v2808_v0  ;;  %2696 = vmatpush3.msra.mxu0 %v1430_v51 }
 0x25f   :  { %2739 = vmatpush3.msra.mxu1 %v3623_v60  ;;  %2697 = vmatprep.subr.mxu0 %v2808_v0 }
 0x260   :  { %2740 = vmatprep.subr.mxu1 %v2808_v0  ;;  %2698 = vmatpush3.msra.mxu0 %v1437_v20 }
 0x261   :  { %2741 = vmatpush3.msra.mxu1 %v3640_v12  ;;  %2699 = vmatprep.subr.mxu0 %v2808_v0 }
 0x262   :  { %2742 = vmatprep.subr.mxu1 %v2808_v0  ;;  %2700 = vmatpush3.msra.mxu0 %v1444_v57 }
 0x263   :  { %2743 = vmatpush3.msra.mxu1 %v3650_v58  ;;  %2701 = vmatprep.subr.mxu0 %v2808_v0 }
 0x264   :  { %2744 = vmatprep.subr.mxu1 %v2808_v0  ;;  %2702 = vmatpush3.msra.mxu0 %v1451_v10 }
 0x265   :  { %2745 = vmatpush3.msra.mxu1 %v3666_v39  ;;  %2703 = vmatprep.subr.mxu0 %v2808_v0 }
 0x266   :  { %2746 = vmatprep.subr.mxu1 %v2808_v0  ;;  %2704 = vmatpush3.msra.mxu0 %v1458_v42 }
 0x267   :  { %2747 = vmatpush3.msra.mxu1 %v3679_v36  ;;  %2748 = vmatprep.mubr.msk.f32.mxu1 %vm2809_vm0, %v2808_v0 }
 0x268   :  { %2705 = vmatprep.subr.mxu0 %v2808_v0  ;;  %2749 = vmatmul.mubr.f32.vlgmr.msra.gmra.mxu1 %v3712_v14 }
 0x269   :  { %2706 = vmatpush3.msra.mxu0 %v3902_v1  ;;  %2713 = vmatprep.mubr.msk.f32.mxu0 %vm2809_vm0, %v2808_v0 }
 0x26a   :  { %2707 = vmatprep.subr.mxu0 %v2808_v0 }
 0x26b   :  { %2708 = vmatpush3.msra.mxu0 %v3903_v5 }
 0x26c   :  { %2709 = vmatprep.subr.mxu0 %v2808_v0 }
 0x26d   :  { %2710 = vmatpush3.msra.mxu0 %v3904_v6 }
 0x26e   :  { %2711 = vmatprep.subr.mxu0 %v2808_v0 }
 0x26f   :  { %2712 = vmatpush3.msra.mxu0 %v3905_v16 }
 0x270   :  { %2714 = vmatmul.mubr.f32.vlgmr.msra.gmra.mxu0 %v3712_v14 }
 0x2e6   :  { %v1525_v17 = vpop.f32.mrf.mxu1 }
 0x2e8   :  { %v2610_v18 = vpop.f32.mrf.mxu1 }
 0x2ee   :  { %v1374_v27 = vpop.f32.mrf.mxu0 }
 0x2ef   :  { %v1375_v41 = vadd.f32 %v1958_v40, %v1374_v27 }
 0x2f0   :  { %v2575_v28 = vpop.f32.mrf.mxu0 }
 0x2f1   :  { %v1526_v0 = vadd.f32 %v1525_v17, %v1375_v41 }
 0x306   :  { %v1718_v29 = vpop.f32.mrf.mxu1 }
 0x308   :  { %v2680_v33 = vpop.f32.mrf.mxu1 }
 0x30f   :  { %v1629_v34 = vpop.f32.mrf.mxu0 }
 0x310   :  { %v1630_v48 = vadd.f32 %v1629_v34, %v1526_v0 }
 0x311   :  { %v2645_v35 = vpop.f32.mrf.mxu0 }
 0x312   :  { %v1719_v52 = vadd.f32 %v1718_v29, %v1630_v48 }
 0x328   :  { %v1924_v46 = vpop.f32.mrf.mxu1 }
 0x32a   :  { %v2750_v47 = vpop.f32.mrf.mxu1 }
 0x330   :  { %v1837_v53 = vpop.f32.mrf.mxu0 }
 0x331   :  { %v1838_v54 = vadd.f32 %v1837_v53, %v1719_v52 }
 0x332   :  { %v2715_v2 = vpop.f32.mrf.mxu0 }
 0x333   :  { %v1925_v9 = vadd.f32 %v1924_v46, %v1838_v54 }
 0x335   :  { %v1929_v38 = vsel %vm1928_vm2, %v1925_v9, -inf }
 0x336   :  { %1930 = vmax.xlane.f32.xlu0 %v1929_v38 }
 0x3bf   :  { %v1931_v51 = vpop.xlane.xlu0 %1930 }
 0x3c0   :  { %v1932_v44 = vsub.f32 %v1925_v9, %v1931_v51 }
 0x3c2   :  { %v1933_v56 = vmul.f32 1.442695, %v1932_v44 }
 0x3c4   :  { %2757 = vpow2.f32 %v1933_v56 }
 0x3d1   :  { %v2758_v3 = vpop.eup %2757 }
 0x3d2   :  { %v1935_v20 = vsel %vm1928_vm2, %v2758_v3, 0.0 }
 0x3d3   :  { %1936 = vadd.xlane.f32.xlu0 %v1935_v20 }
 0x45c   :  { %v1937_v31 = vpop.xlane.xlu0 %1936 }
 0x45d   :  { %2759 = vrcp.f32 %v1937_v31 }
 0x46a   :  { %v2760_v8 = vpop.eup %2759 }
 0x46b   :  { %v1939_v57 = vmul.f32 %v2760_v8, %v2758_v3 }
 0x46d   :  { %1940 = vst.msk [vmem:[#allocation5] sm:$0xff] %vm1928_vm2, %v1939_v57 }
 0x46e   :  { %2792 = shalt.err (!%p2789_p9)
}
 0x46f   :  { %1950 = dma.vmem_to_hbm [thread:$0]  %s1948_s22, 128, %s3889_s7, [#allocation4]  }
 0x470   :  { %2803 = dma.done.wait [#allocation4], 128  }
 0x471   :  { %2804 = vsyncadd [#allocation4], 4294967168 }
 0x472   :  { %1954 = vsyncpa [#allocation3], 1 }
 0x473   :  { %1955 = vsyncpa [#allocation4], 1 }

</bundles_post_ra>
